<compile_context>
chip_gen: v7x
topology: tpu7x:2x2x1
jax: 0.10.0
libtpu: 0.0.40
codegen_flags: <defaults>
</compile_context>

<pallas_src>
import functools

import jax
import jax.numpy as jnp
from jax import lax
from jax.experimental import pallas as pl
from jax.experimental.pallas import tpu as pltpu

_LANES = 128
_SUBLANES = 8
_MAX_BLOCK_BYTES = 4 * 1024 * 1024   # target bytes per input block (4 MiB)
_VMEM_LIMIT = 32 * 1024 * 1024       # safe scoped-VMEM limit on v5e/v6e/v7x


def _cdiv(a, b):
    return -(-a // b)


def _round_up(a, b):
    return _cdiv(a, b) * b


# ----------------------------------------------------------------------------
# Pallas kernel: per-lane partial sums of ((pred+eps) - (true+eps))^2
# ----------------------------------------------------------------------------
def _sse_kernel(p_ref, t_ref, o_ref, *, tm, n_inner, n_blocks, tail_rows):
    o = pl.program_id(0)   # parallel (megacore) axis
    i = pl.program_id(1)   # reduction axis

    @pl.when(i == 0)
    def _init():
        o_ref[...] = jnp.zeros_like(o_ref)

    eps = jnp.float32(1e-6)
    d = (p_ref[...].astype(jnp.float32) + eps) - (t_ref[...].astype(jnp.float32) + eps)
    dd = d * d

    def _accumulate(vals):
        # (tm, 128) -> (tm//8, 8, 128) is a leading-dim split (no relayout);
        # the axis-0 reduce is pure VPU vreg adds into a single (8, 128) vreg.
        o_ref[...] += jnp.sum(vals.reshape(tm // _SUBLANES, _SUBLANES, _LANES), axis=0)

    if tail_rows == tm:
        # Block rows divide the array rows: no masking needed anywhere.
        _accumulate(dd)
    else:
        # Only the globally-last block overhangs the array; its out-of-bounds
        # rows hold unspecified data and must be zeroed before accumulation.
        is_last = (o * n_inner + i) == (n_blocks - 1)

        @pl.when(is_last)
        def _ragged():
            row_ids = lax.broadcasted_iota(jnp.int32, (tm, _LANES), 0)
            _accumulate(jnp.where(row_ids < tail_rows, dd, jnp.float32(0.0)))

        @pl.when(jnp.logical_not(is_last))
        def _full():
            _accumulate(dd)


# ----------------------------------------------------------------------------
# Wrapper
# ----------------------------------------------------------------------------
def nmse_pallas(predictions, true):
    """sqrt(mean(((pred + 1e-6) - (true + 1e-6)) ** 2)) for matching shapes."""
    p = jnp.asarray(predictions)
    t = jnp.asarray(true)
    assert p.shape == t.shape, (p.shape, t.shape)
    n = p.size
    assert n > 0, "empty input"

    # Keep f32 / bf16 streams in their native dtype (cast happens in-kernel);
    # anything else is promoted to f32 up front.
    if p.dtype == jnp.bfloat16 and t.dtype == jnp.bfloat16:
        sub = 16                      # sublane multiple for 16-bit packing
    elif p.dtype == jnp.float32 and t.dtype == jnp.float32:
        sub = _SUBLANES
    else:
        p = p.astype(jnp.float32)
        t = t.astype(jnp.float32)
        sub = _SUBLANES

    pf = p.reshape(-1)
    tf = t.reshape(-1)

    # Lane alignment: the flat stream is viewed as (rows, 128).  If n is not a
    # multiple of 128 fall back to zero padding (padded elements contribute 0).
    if n % _LANES != 0:
        pad = _round_up(n, _LANES) - n
        pf = jnp.pad(pf, (0, pad))
        tf = jnp.pad(tf, (0, pad))
    rows = pf.shape[0] // _LANES

    itemsize = pf.dtype.itemsize
    max_tm = _round_up(_MAX_BLOCK_BYTES // (_LANES * itemsize), sub)

    if rows > max_tm:
        # Multi-block streaming; a ragged final block is masked in-kernel, so
        # no padding (and no HBM copy) is needed for lane-aligned inputs.
        tm = max_tm
    else:
        # Single block covering everything: round the row count up to the
        # sublane multiple with a tiny zero pad (array is at most a few MiB).
        rows_aligned = _round_up(rows, sub)
        if rows_aligned != rows:
            extra = (rows_aligned - rows) * _LANES
            pf = jnp.pad(pf, (0, extra))
            tf = jnp.pad(tf, (0, extra))
            rows = rows_aligned
        tm = rows

    p2 = pf.reshape(rows, _LANES)
    t2 = tf.reshape(rows, _LANES)

    n_blocks = _cdiv(rows, tm)
    tail_rows = rows - (n_blocks - 1) * tm    # rows of real data in last block
    # Split the stream across both TensorCores on v7x when it divides evenly;
    # on 1-TC chips the extra "parallel" axis is just a cheap outer loop.
    n_outer = 2 if (n_blocks >= 2 and n_blocks % 2 == 0) else 1
    n_inner = n_blocks // n_outer

    kernel = functools.partial(
        _sse_kernel, tm=tm, n_inner=n_inner, n_blocks=n_blocks, tail_rows=tail_rows)

    partials = pl.pallas_call(
        kernel,
        out_shape=jax.ShapeDtypeStruct((n_outer, _SUBLANES, _LANES), jnp.float32),
        grid_spec=pltpu.PrefetchScalarGridSpec(
            num_scalar_prefetch=0,
            grid=(n_outer, n_inner),
            in_specs=[
                pl.BlockSpec((tm, _LANES), lambda o, i: (o * n_inner + i, 0)),
                pl.BlockSpec((tm, _LANES), lambda o, i: (o * n_inner + i, 0)),
            ],
            out_specs=pl.BlockSpec((None, _SUBLANES, _LANES), lambda o, i: (o, 0, 0)),
        ),
        compiler_params=pltpu.CompilerParams(
            dimension_semantics=("parallel", "arbitrary"),
            vmem_limit_bytes=_VMEM_LIMIT,
        ),
    )(p2, t2)

    # Trivial epilogue: combine <=2 vreg-sized partials, mean over the true
    # element count, sqrt.
    sse = jnp.sum(partials)
    return jnp.sqrt(sse * jnp.float32(1.0 / n))


# ----------------------------------------------------------------------------
# Module-like wrapper mirroring the PyTorch NMSE nn.Module
# ----------------------------------------------------------------------------
class NMSEPallas:
    """JAX/Pallas port of the PyTorch NMSE module (RMSE with an eps shift)."""

    def forward(self, predictions, true):
        return nmse_pallas(predictions, true)

    __call__ = forward


def _ref_nmse(p, t):
    p = jnp.asarray(p, jnp.float32)
    t = jnp.asarray(t, jnp.float32)
    return jnp.sqrt(jnp.mean(((p + 1e-6) - (t + 1e-6)) ** 2))


# ----------------------------------------------------------------------------
# Demo / self-test
# ----------------------------------------------------------------------------
if __name__ == "__main__":
    key = jax.random.PRNGKey(0)
    k = jax.random.split(key, 8)
    model = NMSEPallas()

    # Small (batch=2, channels=4, 16, 16) activation-like inputs.
    pred = jax.random.normal(k[0], (2, 4, 16, 16), dtype=jnp.float32)
    true = jax.random.normal(k[1], (2, 4, 16, 16), dtype=jnp.float32)
    out = jax.block_until_ready(model(pred, true))
    ref = _ref_nmse(pred, true)
    assert out.shape == (), out.shape
    assert out.dtype == jnp.float32, out.dtype
    assert jnp.allclose(out, ref, rtol=1e-4, atol=1e-6), (float(out), float(ref))

    # Lane-unaligned size: exercises the zero-pad fallback path.
    p2 = jax.random.normal(k[2], (300, 900), dtype=jnp.float32)
    t2 = jax.random.normal(k[3], (300, 900), dtype=jnp.float32)
    out2 = jax.block_until_ready(model(p2, t2))
    ref2 = _ref_nmse(p2, t2)
    assert jnp.allclose(out2, ref2, rtol=1e-4, atol=1e-6), (float(out2), float(ref2))

    # Lane-aligned multi-block size: copy-free streaming, ragged last block
    # masked in-kernel, 2-way parallel outer axis.
    p3 = jax.random.normal(k[4], (132, 8192), dtype=jnp.float32)
    t3 = jax.random.normal(k[5], (132, 8192), dtype=jnp.float32)
    out3 = jax.block_until_ready(model(p3, t3))
    ref3 = _ref_nmse(p3, t3)
    assert jnp.allclose(out3, ref3, rtol=1e-4, atol=1e-6), (float(out3), float(ref3))

    # bf16 inputs streamed as bf16 and cast to f32 inside the kernel.
    p4 = jax.random.normal(k[6], (4, 128, 16), dtype=jnp.bfloat16)
    t4 = jax.random.normal(k[7], (4, 128, 16), dtype=jnp.bfloat16)
    out4 = jax.block_until_ready(model(p4, t4))
    ref4 = _ref_nmse(p4, t4)
    assert jnp.allclose(out4, ref4, rtol=2e-3, atol=1e-6), (float(out4), float(ref4))

    print("KERNEL_OK")
</pallas_src>

<mosaic_0001>
module attributes {stable_mosaic.version = 11 : i64} {
  func.func @_sse_kernel(%arg0: i32, %arg1: i32, %arg2: memref<16x128xf32, #tpu.memory_space<vmem>>, %arg3: memref<16x128xf32, #tpu.memory_space<vmem>>, %arg4: memref<1x8x128xf32, #tpu.memory_space<vmem>>) attributes {dimension_semantics = [#tpu.dimension_semantics<parallel>, #tpu.dimension_semantics<arbitrary>], iteration_bounds = array<i64: 1, 1>, scalar_prefetch = 0 : i64, scratch_operands = 0 : i64, tpu.core_type = #tpu.core_type<tc>, window_params = [{transform_indices = @transform_0, window_bounds = array<i64: 16, 128>}, {transform_indices = @transform_1, window_bounds = array<i64: 16, 128>}, {transform_indices = @transform_2, window_bounds = array<i64: 1, 8, 128>}]} {
    %c0_i32 = arith.constant 0 : i32
    %0 = arith.cmpi eq, %arg1, %c0_i32 : i32
    %1 = arith.extui %0 : i1 to i32
    %c0_i32_0 = arith.constant 0 : i32
    %2 = arith.cmpi ne, %1, %c0_i32_0 : i32
    scf.if %2 {
      %cst_12 = arith.constant 0.000000e+00 : f32
      %19 = vector.broadcast %cst_12 : f32 to vector<8x128xf32>
      %c0_13 = arith.constant 0 : index
      %c0_14 = arith.constant 0 : index
      %c0_15 = arith.constant 0 : index
      %20 = vector.load %arg4[%c0_13, %c0_14, %c0_15] : memref<1x8x128xf32, #tpu.memory_space<vmem>>, vector<1x8x128xf32>
      %21 = vector.shape_cast %20 : vector<1x8x128xf32> to vector<8x128xf32>
      %22 = vector.shape_cast %19 : vector<8x128xf32> to vector<1x8x128xf32>
      tpu.vector_store %arg4[%c0_13, %c0_14, %c0_15], %22 {strides = array<i32>} : memref<1x8x128xf32, #tpu.memory_space<vmem>>, vector<1x8x128xf32>,
    } else {
    }
    %c0 = arith.constant 0 : index
    %c0_1 = arith.constant 0 : index
    %3 = vector.load %arg2[%c0, %c0_1] : memref<16x128xf32, #tpu.memory_space<vmem>>, vector<16x128xf32>
    %cst = arith.constant 9.99999997E-7 : f32
    %4 = vector.broadcast %cst : f32 to vector<16x128xf32>
    %5 = arith.addf %3, %4 : vector<16x128xf32>
    %c0_2 = arith.constant 0 : index
    %c0_3 = arith.constant 0 : index
    %6 = vector.load %arg3[%c0_2, %c0_3] : memref<16x128xf32, #tpu.memory_space<vmem>>, vector<16x128xf32>
    %cst_4 = arith.constant 9.99999997E-7 : f32
    %7 = vector.broadcast %cst_4 : f32 to vector<16x128xf32>
    %8 = arith.addf %6, %7 : vector<16x128xf32>
    %9 = arith.subf %5, %8 : vector<16x128xf32>
    %10 = arith.mulf %9, %9 : vector<16x128xf32>
    %c0_5 = arith.constant 0 : index
    %c0_6 = arith.constant 0 : index
    %c0_7 = arith.constant 0 : index
    %11 = vector.load %arg4[%c0_5, %c0_6, %c0_7] : memref<1x8x128xf32, #tpu.memory_space<vmem>>, vector<1x8x128xf32>
    %12 = vector.shape_cast %11 : vector<1x8x128xf32> to vector<8x128xf32>
    %13 = vector.shape_cast %10 : vector<16x128xf32> to vector<2x8x128xf32>
    %cst_8 = arith.constant dense<0.000000e+00> : vector<8x128xf32>
    %14 = vector.multi_reduction <add>, %13, %cst_8 [0] : vector<2x8x128xf32> to vector<8x128xf32>
    %15 = arith.addf %12, %14 : vector<8x128xf32>
    %c0_9 = arith.constant 0 : index
    %c0_10 = arith.constant 0 : index
    %c0_11 = arith.constant 0 : index
    %16 = vector.load %arg4[%c0_9, %c0_10, %c0_11] : memref<1x8x128xf32, #tpu.memory_space<vmem>>, vector<1x8x128xf32>
    %17 = vector.shape_cast %16 : vector<1x8x128xf32> to vector<8x128xf32>
    %18 = vector.shape_cast %15 : vector<8x128xf32> to vector<1x8x128xf32>
    tpu.vector_store %arg4[%c0_9, %c0_10, %c0_11], %18 {strides = array<i32>} : memref<1x8x128xf32, #tpu.memory_space<vmem>>, vector<1x8x128xf32>,
    return
  }
  func.func @transform_0(%arg0: i32, %arg1: i32) -> (i32, i32) {
    %c1_i32 = arith.constant 1 : i32
    %0 = arith.muli %arg0, %c1_i32 : i32
    %1 = arith.addi %0, %arg1 : i32
    %c0_i32 = arith.constant 0 : i32
    %c0_i32_0 = arith.constant 0 : i32
    return %1, %c0_i32 : i32, i32
  }
  func.func @transform_1(%arg0: i32, %arg1: i32) -> (i32, i32) {
    %c1_i32 = arith.constant 1 : i32
    %0 = arith.muli %arg0, %c1_i32 : i32
    %1 = arith.addi %0, %arg1 : i32
    %c0_i32 = arith.constant 0 : i32
    %c0_i32_0 = arith.constant 0 : i32
    return %1, %c0_i32 : i32, i32
  }
  func.func @transform_2(%arg0: i32, %arg1: i32) -> (i32, i32, i32) {
    %c0_i32 = arith.constant 0 : i32
    %c0_i32_0 = arith.constant 0 : i32
    %c0_i32_1 = arith.constant 0 : i32
    return %arg0, %c0_i32, %c0_i32_0 : i32, i32, i32
  }
}

</mosaic_0001>

<bundles_post_ra>
// kernel: tpu_custom_call.1
= control target key start
LH: loop header
LB: loop body
LE: loop exit
PB: predicated region body
PF: predicated region fallthrough
CT: control target
= control target key end

     0   :  { %7 = vsyncpa [#allocation3], 0  ;;  %s223_s0 = inlined_call_operand.hbm [shape: f32[16,128], index: 0, kind: input, shape index: {}]   ;;  %s224_s1 = inlined_call_operand.hbm [shape: f32[16,128], index: 1, kind: input, shape index: {}]   ;;  %s225_s2 = inlined_call_operand.hbm [shape: f32[1,8,128], index: 2, kind: output, shape index: {}]  }
   0x1   :  { %8 = vsyncpa [#allocation6], 0 }
   0x2   :  { %9 = vsyncpa [#allocation4], 0  ;;  %s167_s9 = smov [#allocation2]   ;;  %s95_s13 = scalar_lea.hbm %s223_s0, 256 }
   0x3   :  { %s19_s10 = sshll.u32 %s167_s9, 4  ;;  %p96_p0 = scmp.ne.s32.totalorder %s223_s0, %s95_s13  ;;  %s20_s10 = int_to_ptr.vmem [resolvable:$true] %s19_s10 }
   0x4   :  { %p99_p1 = scmp.lt.u32.totalorder %s95_s13, %s223_s0 }
   0x6   :  { %p101_p2 = pnand %p99_p1, %p96_p0 }
   0x8   :  { %104 = shalt.err (!%p101_p2)
}
   0x9   :  { %s105_s18 = scalar_lea.vmem %s20_s10, 256  ;;  %p110_p4 = scmp.lt.s32.totalorder %s20_s10, %s20_s10 }
   0xa   :  { %p106_p3 = scmp.ne.s32.totalorder %s20_s10, %s105_s18  ;;  %p111_p5 = scmp.lt.s32.totalorder %s105_s18, %s105_s18 }
   0xc   :  { %p112_p6 = por %p111_p5, %p110_p4 }
   0xe   :  { %p113_p7 = pnand %p112_p6, %p106_p3 }
  0x10   :  { %116 = shalt.err (!%p113_p7)
}
  0x11   :  { %s168_s19 = smov 128   ;;  %s169_s20 = smov 8  }
  0x12   :  { %25 = dma.hbm_to_vmem [thread:$0]  %s223_s0, 256, %s20_s10, [#allocation3], %s168_s19, %s168_s19, %s169_s20  }
  0x13   :  { %s170_s23 = smov [#allocation5]   ;;  %s117_s27 = scalar_lea.hbm %s224_s1, 256 }
  0x14   :  { %s35_s24 = sshll.u32 %s170_s23, 4  ;;  %p118_p8 = scmp.ne.s32.totalorder %s224_s1, %s117_s27  ;;  %s36_s24 = int_to_ptr.vmem [resolvable:$true] %s35_s24 }
  0x15   :  { %p121_p9 = scmp.lt.u32.totalorder %s117_s27, %s224_s1 }
  0x17   :  { %p123_p10 = pnand %p121_p9, %p118_p8 }
  0x19   :  { %126 = shalt.err (!%p123_p10)
}
  0x1a   :  { %s127_s4 = scalar_lea.vmem %s36_s24, 256  ;;  %p132_p12 = scmp.lt.s32.totalorder %s36_s24, %s36_s24 }
  0x1b   :  { %p128_p11 = scmp.ne.s32.totalorder %s36_s24, %s127_s4  ;;  %p133_p13 = scmp.lt.s32.totalorder %s127_s4, %s127_s4 }
  0x1d   :  { %p134_p0 = por %p133_p13, %p132_p12 }
  0x1f   :  { %p135_p1 = pnand %p134_p0, %p128_p11 }
  0x21   :  { %138 = shalt.err (!%p135_p1)
}
  0x22   :  { %41 = dma.hbm_to_vmem [thread:$0]  %s224_s1, 256, %s36_s24, [#allocation6], %s168_s19, %s168_s19, %s169_s20  }
  0x23   :  { %161 = dma.done.wait [#allocation3], 256  }
  0x24   :  { %162 = vsyncadd [#allocation3], 4294967040 }
  0x25   :  { %163 = dma.done.wait [#allocation6], 256  }
  0x26   :  { %164 = vsyncadd [#allocation6], 4294967040  ;;  %v57_v0 = vld [vmem:[#allocation2] sm:$0xff]  ;;  %v58_v1 = vld [vmem:[#allocation2 + $0x8] sm:$0xff]  ;;  %s171_s6 = smov [#allocation7]  }
  0x27   :  { %v61_v2 = vld [vmem:[#allocation5] sm:$0xff]  ;;  %v59_v3 = vadd.f32 1e-06, %v57_v0  ;;  %v60_v4 = vadd.f32 1e-06, %v58_v1  ;;  %v62_v5 = vld [vmem:[#allocation5 + $0x8] sm:$0xff] }
  0x28   :  { %v63_v6 = vadd.f32 1e-06, %v61_v2  ;;  %v64_v7 = vadd.f32 1e-06, %v62_v5  ;;  %s79_s7 = sshll.u32 %s171_s6, 4  ;;  %s80_s7 = int_to_ptr.vmem [resolvable:$true] %s79_s7 }
  0x29   :  { %s139_s1 = scalar_lea.vmem %s80_s7, 128  ;;  %p144_p3 = scmp.lt.s32.totalorder %s80_s7, %s80_s7 }
  0x2a   :  { %v65_v8 = vsub.f32 %v59_v3, %v63_v6  ;;  %v66_v9 = vsub.f32 %v60_v4, %v64_v7  ;;  %p140_p2 = scmp.ne.s32.totalorder %s80_s7, %s139_s1  ;;  %p145_p4 = scmp.lt.s32.totalorder %s139_s1, %s139_s1 }
  0x2c   :  { %v67_v10 = vmul.f32 %v65_v8, %v65_v8  ;;  %v68_v11 = vmul.f32 %v66_v9, %v66_v9  ;;  %p146_p5 = por %p145_p4, %p144_p3 }
  0x2e   :  { %v70_v12 = vadd.f32 %v68_v11, %v67_v10  ;;  %p147_p6 = pnand %p146_p5, %p140_p2 }
  0x30   :  { %72 = vst [vmem:[#allocation7] sm:$0xff] %v70_v12 }
  0x31   :  { %150 = shalt.err (!%p147_p6)
}
  0x32   :  { %s151_s10 = scalar_lea.hbm %s225_s2, 128 }
  0x33   :  { %p152_p7 = scmp.ne.s32.totalorder %s225_s2, %s151_s10  ;;  %p155_p8 = scmp.lt.u32.totalorder %s151_s10, %s225_s2 }
  0x35   :  { %p157_p9 = pnand %p155_p8, %p152_p7 }
  0x37   :  { %160 = shalt.err (!%p157_p9)
}
  0x38   :  { %82 = dma.vmem_to_hbm [thread:$0]  %s80_s7, 128, %s225_s2, [#allocation4]  }
  0x39   :  { %165 = dma.done.wait [#allocation4], 128  }
  0x3a   :  { %166 = vsyncadd [#allocation4], 4294967168 }
  0x3b   :  { %86 = vsyncpa [#allocation3], 1 }
  0x3c   :  { %87 = vsyncpa [#allocation6], 1 }
  0x3d   :  { %88 = vsyncpa [#allocation4], 1 }

</bundles_post_ra>
